<compile_context>
chip_gen: v7x
topology: tpu7x:2x2x1
jax: 0.10.0
libtpu: 0.0.40
codegen_flags: <defaults>
</compile_context>

<pallas_src>
import jax
import jax.numpy as jnp
from jax.experimental import pallas as pl
from jax.experimental.pallas import tpu as pltpu

# ------------------------- hyper-parameters ---------------------------------
LINEAR_SIZE = 128      # l_size of the ResidualBlock (lane-dense: multiple of 128)
BATCH = 256            # demo batch
BN_EPS = 1e-5
USE_BF16 = True        # bf16 MXU inputs, f32 accumulation
MAX_TILE_B = 1024      # cap so one tile's double-buffered f32 x/out fits VMEM
                       # comfortably even on v7x's 64 MiB (re-derive if L grows)


# ------------------------------- Pallas kernel ------------------------------
def residual_block_kernel(x_ref, w1_ref, b1_ref, w2_ref, b2_ref, o_ref):
    x = x_ref[...]                                            # (TILE_B, L) f32

    # layer 1: Linear with folded BN, then ReLU   (dropout == identity, eval)
    y = jnp.dot(x.astype(w1_ref.dtype), w1_ref[...],
                preferred_element_type=jnp.float32)
    y = jnp.maximum(y + b1_ref[...], 0.0)

    # layer 2: Linear with folded BN, then ReLU
    y = jnp.dot(y.astype(w2_ref.dtype), w2_ref[...],
                preferred_element_type=jnp.float32)
    y = jnp.maximum(y + b2_ref[...], 0.0)

    # residual add in f32
    o_ref[...] = x + y


# --------------------------- device-aware tiling -----------------------------
def _tensorcores_per_chip():
    """v7x has 2 TensorCores per chip; v5e/v6e have 1 (conservative default 1)."""
    try:
        kind = jax.devices()[0].device_kind.lower()
    except Exception:
        return 1
    return 2 if "v7" in kind else 1


def _pick_tile_b(batch, num_tiles):
    """One batch tile per TensorCore, rounded up to the sublane multiple (8)."""
    tile = -(-batch // num_tiles)                  # cdiv
    tile = ((tile + 7) // 8) * 8
    return max(8, min(tile, MAX_TILE_B))


def residual_block_forward(x, params):
    """Run the ResidualBlock forward in one pallas_call, tiled over batch."""
    w1, b1, w2, b2 = params
    B, L = x.shape

    tile_b = _pick_tile_b(B, _tensorcores_per_chip())
    grid_b = pl.cdiv(B, tile_b)                    # ragged last block is legal

    # Weight/bias tiles use constant index_maps -> fetched once, VMEM-resident.
    full2d = lambda shape: pl.BlockSpec(shape, lambda i: (0, 0))

    # Advisory cost hint: 2 matmuls (2*B*L*L MACs each), f32 x + out, bf16 weights.
    cost = pl.CostEstimate(
        flops=4 * B * L * L,
        transcendentals=0,
        bytes_accessed=2 * B * L * 4 + 2 * L * L * w1.dtype.itemsize + 2 * L * 4,
    )

    out = pl.pallas_call(
        residual_block_kernel,
        out_shape=jax.ShapeDtypeStruct((B, L), jnp.float32),
        grid_spec=pltpu.PrefetchScalarGridSpec(
            num_scalar_prefetch=0,
            grid=(grid_b,),
            in_specs=[
                pl.BlockSpec((tile_b, L), lambda i: (i, 0)),   # x tile
                full2d((L, L)),                                # W1' (BN folded, bf16)
                full2d((1, L)),                                # b1' (f32)
                full2d((L, L)),                                # W2'
                full2d((1, L)),                                # b2'
            ],
            out_specs=pl.BlockSpec((tile_b, L), lambda i: (i, 0)),
        ),
        compiler_params=pltpu.CompilerParams(
            dimension_semantics=("parallel",)),
        cost_estimate=cost,
    )(x, w1, b1, w2, b2)
    return out


# ----------------------- deterministic parameter init -----------------------
def init_raw_params(key, l_size):
    """PyTorch-layout raw parameters: Linear (out,in) weights + BN stats."""
    def linear(k, fan_in, fan_out):
        kw, kb = jax.random.split(k)
        w = jax.random.normal(kw, (fan_out, fan_in), jnp.float32) * (
            (2.0 / fan_in) ** 0.5)
        b = jax.random.normal(kb, (fan_out,), jnp.float32) * 0.01
        return w, b

    def bn(k, n):
        kg, kb, km, kv = jax.random.split(k, 4)
        gamma = 1.0 + 0.1 * jax.random.normal(kg, (n,), jnp.float32)
        beta = 0.1 * jax.random.normal(kb, (n,), jnp.float32)
        mean = 0.1 * jax.random.normal(km, (n,), jnp.float32)
        var = jnp.abs(jax.random.normal(kv, (n,), jnp.float32)) + 0.5
        return gamma, beta, mean, var

    k1, k2, k3, k4 = jax.random.split(key, 4)
    w1, b1 = linear(k1, l_size, l_size)
    bn1 = bn(k2, l_size)
    w2, b2 = linear(k3, l_size, l_size)
    bn2 = bn(k4, l_size)
    return (w1, b1, bn1, w2, b2, bn2)


def fold_params(raw, use_bf16=USE_BF16):
    """Fold eval-mode BatchNorm into the Linear weights/bias; cast weights."""
    w1, b1, (g1, be1, m1, v1), w2, b2, (g2, be2, m2, v2) = raw

    def fold(w, b, gamma, beta, mean, var):
        s = gamma * jax.lax.rsqrt(var + BN_EPS)        # (L,)
        t = beta - mean * s
        wf = w.T * s[None, :]                          # (in, out) * per-output scale
        bf = (b * s + t)[None, :].astype(jnp.float32)  # (1, L)
        if use_bf16:
            wf = wf.astype(jnp.bfloat16)
        return wf, bf

    w1f, b1f = fold(w1, b1, g1, be1, m1, v1)
    w2f, b2f = fold(w2, b2, g2, be2, m2, v2)
    return (w1f, b1f, w2f, b2f)


# ------------------------------ references ----------------------------------
def reference_forward_folded(x, params):
    """Pure-JAX reference that matches the kernel's dtype handling exactly."""
    w1, b1, w2, b2 = params
    y = jnp.maximum(
        jnp.dot(x.astype(w1.dtype), w1, preferred_element_type=jnp.float32) + b1,
        0.0)
    y = jnp.maximum(
        jnp.dot(y.astype(w2.dtype), w2, preferred_element_type=jnp.float32) + b2,
        0.0)
    return x + y


def reference_forward_torch(x, raw):
    """Full-f32 reference of the original PyTorch module in eval mode."""
    w1, b1, (g1, be1, m1, v1), w2, b2, (g2, be2, m2, v2) = raw
    y = x @ w1.T + b1
    y = g1 * (y - m1) * jax.lax.rsqrt(v1 + BN_EPS) + be1
    y = jnp.maximum(y, 0.0)                 # dropout == identity in eval
    y = y @ w2.T + b2
    y = g2 * (y - m2) * jax.lax.rsqrt(v2 + BN_EPS) + be2
    y = jnp.maximum(y, 0.0)
    return x + y


# ------------------------------------ main -----------------------------------
if __name__ == "__main__":
    key = jax.random.PRNGKey(0)
    kx, kp = jax.random.split(key)
    x = jax.random.normal(kx, (BATCH, LINEAR_SIZE), jnp.float32)

    raw_params = init_raw_params(kp, LINEAR_SIZE)
    params = fold_params(raw_params)

    out = residual_block_forward(x, params)
    out = jax.block_until_ready(out)
    assert out.shape == (BATCH, LINEAR_SIZE)

    # dtype-matched reference (same bf16 rounding / f32 accumulation)
    ref_folded = reference_forward_folded(x, params)
    assert jnp.allclose(out, ref_folded, atol=1e-2, rtol=1e-2), \
        "mismatch vs dtype-matched reference"

    # full-precision reference of the original PyTorch eval-mode semantics
    ref_torch = reference_forward_torch(x, raw_params)
    assert jnp.allclose(out, ref_torch, atol=1e-1, rtol=1e-1), \
        "mismatch vs f32 PyTorch-semantics reference"

    print("KERNEL_OK")
</pallas_src>

<mosaic_0001>
module attributes {stable_mosaic.version = 11 : i64} {
  func.func @residual_block_kernel(%arg0: i32, %arg1: memref<256x128xf32, #tpu.memory_space<vmem>>, %arg2: memref<128x128xbf16, #tpu.memory_space<vmem>>, %arg3: memref<1x128xf32, #tpu.memory_space<vmem>>, %arg4: memref<128x128xbf16, #tpu.memory_space<vmem>>, %arg5: memref<1x128xf32, #tpu.memory_space<vmem>>, %arg6: memref<256x128xf32, #tpu.memory_space<vmem>>) attributes {dimension_semantics = [#tpu.dimension_semantics<parallel>], iteration_bounds = array<i64: 1>, scalar_prefetch = 0 : i64, scratch_operands = 0 : i64, tpu.core_type = #tpu.core_type<tc>, window_params = [{transform_indices = @transform_0, window_bounds = array<i64: 256, 128>}, {pipeline_mode = #tpu.pipeline_mode<synchronous>, transform_indices = @transform_1, window_bounds = array<i64: 128, 128>}, {pipeline_mode = #tpu.pipeline_mode<synchronous>, transform_indices = @transform_2, window_bounds = array<i64: 1, 128>}, {pipeline_mode = #tpu.pipeline_mode<synchronous>, transform_indices = @transform_3, window_bounds = array<i64: 128, 128>}, {pipeline_mode = #tpu.pipeline_mode<synchronous>, transform_indices = @transform_4, window_bounds = array<i64: 1, 128>}, {transform_indices = @transform_5, window_bounds = array<i64: 256, 128>}]} {
    %c0 = arith.constant 0 : index
    %c0_0 = arith.constant 0 : index
    %0 = vector.load %arg1[%c0, %c0_0] : memref<256x128xf32, #tpu.memory_space<vmem>>, vector<256x128xf32>
    %1 = arith.truncf %0 : vector<256x128xf32> to vector<256x128xbf16>
    %c0_1 = arith.constant 0 : index
    %c0_2 = arith.constant 0 : index
    %2 = vector.load %arg2[%c0_1, %c0_2] : memref<128x128xbf16, #tpu.memory_space<vmem>>, vector<128x128xbf16>
    %cst = arith.constant dense<0.000000e+00> : vector<256x128xf32>
    %3 = tpu.matmul %1, %2, %cst {dimension_numbers = #tpu.dot_dimension_numbers<[1], [0], [0], [1], [0, 0, 1, 1], [], []>} : vector<256x128xbf16>, vector<128x128xbf16>, vector<256x128xf32> -> vector<256x128xf32>
    %c0_3 = arith.constant 0 : index
    %c0_4 = arith.constant 0 : index
    %4 = vector.load %arg3[%c0_3, %c0_4] : memref<1x128xf32, #tpu.memory_space<vmem>>, vector<1x128xf32>
    %5 = vector.broadcast %4 : vector<1x128xf32> to vector<256x128xf32>
    %6 = arith.addf %3, %5 : vector<256x128xf32>
    %cst_5 = arith.constant 0.000000e+00 : f32
    %7 = vector.broadcast %cst_5 : f32 to vector<256x128xf32>
    %8 = arith.maximumf %6, %7 : vector<256x128xf32>
    %9 = arith.truncf %8 : vector<256x128xf32> to vector<256x128xbf16>
    %c0_6 = arith.constant 0 : index
    %c0_7 = arith.constant 0 : index
    %10 = vector.load %arg4[%c0_6, %c0_7] : memref<128x128xbf16, #tpu.memory_space<vmem>>, vector<128x128xbf16>
    %cst_8 = arith.constant dense<0.000000e+00> : vector<256x128xf32>
    %11 = tpu.matmul %9, %10, %cst_8 {dimension_numbers = #tpu.dot_dimension_numbers<[1], [0], [0], [1], [0, 0, 1, 1], [], []>} : vector<256x128xbf16>, vector<128x128xbf16>, vector<256x128xf32> -> vector<256x128xf32>
    %c0_9 = arith.constant 0 : index
    %c0_10 = arith.constant 0 : index
    %12 = vector.load %arg5[%c0_9, %c0_10] : memref<1x128xf32, #tpu.memory_space<vmem>>, vector<1x128xf32>
    %13 = vector.broadcast %12 : vector<1x128xf32> to vector<256x128xf32>
    %14 = arith.addf %11, %13 : vector<256x128xf32>
    %cst_11 = arith.constant 0.000000e+00 : f32
    %15 = vector.broadcast %cst_11 : f32 to vector<256x128xf32>
    %16 = arith.maximumf %14, %15 : vector<256x128xf32>
    %17 = arith.addf %0, %16 : vector<256x128xf32>
    %c0_12 = arith.constant 0 : index
    %c0_13 = arith.constant 0 : index
    %18 = vector.load %arg6[%c0_12, %c0_13] : memref<256x128xf32, #tpu.memory_space<vmem>>, vector<256x128xf32>
    tpu.vector_store %arg6[%c0_12, %c0_13], %17 {strides = array<i32>} : memref<256x128xf32, #tpu.memory_space<vmem>>, vector<256x128xf32>,
    return
  }
  func.func @transform_0(%arg0: i32) -> (i32, i32) {
    %c0_i32 = arith.constant 0 : i32
    %c0_i32_0 = arith.constant 0 : i32
    return %arg0, %c0_i32 : i32, i32
  }
  func.func @transform_1(%arg0: i32) -> (i32, i32) {
    %c0_i32 = arith.constant 0 : i32
    %c0_i32_0 = arith.constant 0 : i32
    %c0_i32_1 = arith.constant 0 : i32
    return %c0_i32, %c0_i32_0 : i32, i32
  }
  func.func @transform_2(%arg0: i32) -> (i32, i32) {
    %c0_i32 = arith.constant 0 : i32
    %c0_i32_0 = arith.constant 0 : i32
    %c0_i32_1 = arith.constant 0 : i32
    return %c0_i32, %c0_i32_0 : i32, i32
  }
  func.func @transform_3(%arg0: i32) -> (i32, i32) {
    %c0_i32 = arith.constant 0 : i32
    %c0_i32_0 = arith.constant 0 : i32
    %c0_i32_1 = arith.constant 0 : i32
    return %c0_i32, %c0_i32_0 : i32, i32
  }
  func.func @transform_4(%arg0: i32) -> (i32, i32) {
    %c0_i32 = arith.constant 0 : i32
    %c0_i32_0 = arith.constant 0 : i32
    %c0_i32_1 = arith.constant 0 : i32
    return %c0_i32, %c0_i32_0 : i32, i32
  }
  func.func @transform_5(%arg0: i32) -> (i32, i32) {
    %c0_i32 = arith.constant 0 : i32
    %c0_i32_0 = arith.constant 0 : i32
    return %arg0, %c0_i32 : i32, i32
  }
}

</mosaic_0001>

<bundles_post_ra>
// kernel: tpu_custom_call.1
= control target key start
LH: loop header
LB: loop body
LE: loop exit
PB: predicated region body
PF: predicated region fallthrough
CT: control target
= control target key end

     0   :  { %10 = vsyncpa [#allocation3], 0  ;;  %s1317_s0 = inlined_call_operand.hbm [shape: f32[256,128], index: 0, kind: input, shape index: {}]   ;;  %s1318_s1 = inlined_call_operand.hbm [shape: bf16[128,128], index: 1, kind: input, shape index: {}]   ;;  %s1319_s2 = inlined_call_operand.vmem [shape: f32[1,128], index: 2, kind: input, shape index: {}]   ;;  %s1320_s3 = inlined_call_operand.hbm [shape: bf16[128,128], index: 3, kind: input, shape index: {}]   ;;  %s1321_s4 = inlined_call_operand.vmem [shape: f32[1,128], index: 4, kind: input, shape index: {}]   ;;  %s1322_s5 = inlined_call_operand.hbm [shape: f32[256,128], index: 5, kind: output, shape index: {}]  }
   0x1   :  { %11 = vsyncpa [#allocation6], 0 }
   0x2   :  { %12 = vsyncpa [#allocation4], 0  ;;  %s1017_s18 = smov [#allocation5]   ;;  %s923_s22 = scalar_lea.hbm %s1318_s1, 1024 }
   0x3   :  { %s30_s19 = sshll.u32 %s1017_s18, 4  ;;  %p924_p0 = scmp.ne.s32.totalorder %s1318_s1, %s923_s22  ;;  %s31_s19 = int_to_ptr.vmem [resolvable:$true] %s30_s19 }
   0x4   :  { %p927_p1 = scmp.lt.u32.totalorder %s923_s22, %s1318_s1 }
   0x6   :  { %p929_p2 = pnand %p927_p1, %p924_p0 }
   0x8   :  { %932 = shalt.err (!%p929_p2)
}
   0x9   :  { %s933_s27 = scalar_lea.vmem %s31_s19, 1024  ;;  %p938_p4 = scmp.lt.s32.totalorder %s31_s19, %s31_s19 }
   0xa   :  { %p934_p3 = scmp.ne.s32.totalorder %s31_s19, %s933_s27  ;;  %p939_p5 = scmp.lt.s32.totalorder %s933_s27, %s933_s27 }
   0xc   :  { %p940_p6 = por %p939_p5, %p938_p4 }
   0xe   :  { %p941_p7 = pnand %p940_p6, %p934_p3 }
  0x10   :  { %944 = shalt.err (!%p941_p7)
}
  0x11   :  { %s1018_s28 = smov 64   ;;  %s1019_s29 = smov 4  }
  0x12   :  { %36 = dma.hbm_to_vmem [thread:$0]  %s1318_s1, 1024, %s31_s19, [#allocation6], %s1018_s28, %s1018_s28, %s1019_s29  }
  0x13   :  { %s1020_s7 = smov [#allocation2]   ;;  %s945_s11 = scalar_lea.hbm %s1317_s0, 4096 }
  0x14   :  { %s18_s8 = sshll.u32 %s1020_s7, 4  ;;  %p946_p8 = scmp.ne.s32.totalorder %s1317_s0, %s945_s11  ;;  %s19_s8 = int_to_ptr.vmem [resolvable:$true] %s18_s8 }
  0x15   :  { %p949_p9 = scmp.lt.u32.totalorder %s945_s11, %s1317_s0 }
  0x17   :  { %p951_p10 = pnand %p949_p9, %p946_p8 }
  0x19   :  { %954 = shalt.err (!%p951_p10)
}
  0x1a   :  { %s955_s16 = scalar_lea.vmem %s19_s8, 4096  ;;  %p960_p12 = scmp.lt.s32.totalorder %s19_s8, %s19_s8 }
  0x1b   :  { %p956_p11 = scmp.ne.s32.totalorder %s19_s8, %s955_s16  ;;  %p961_p13 = scmp.lt.s32.totalorder %s955_s16, %s955_s16 }
  0x1d   :  { %p962_p0 = por %p961_p13, %p960_p12 }
  0x1f   :  { %p963_p1 = pnand %p962_p0, %p956_p11 }
  0x21   :  { %966 = shalt.err (!%p963_p1)
}
  0x22   :  { %s1021_s1 = smov 128   ;;  %s1022_s17 = smov 8  }
  0x23   :  { %24 = dma.hbm_to_vmem [thread:$0]  %s1317_s0, 4096, %s19_s8, [#allocation3], %s1021_s1, %s1021_s1, %s1022_s17  }
  0x24   :  { %s1023_s20 = smov [#allocation7]   ;;  %s967_s24 = scalar_lea.hbm %s1320_s3, 1024 }
  0x25   :  { %s44_s21 = sshll.u32 %s1023_s20, 4  ;;  %p968_p2 = scmp.ne.s32.totalorder %s1320_s3, %s967_s24  ;;  %s45_s21 = int_to_ptr.vmem [resolvable:$true] %s44_s21 }
  0x26   :  { %p971_p3 = scmp.lt.u32.totalorder %s967_s24, %s1320_s3 }
  0x28   :  { %p973_p4 = pnand %p971_p3, %p968_p2 }
  0x2a   :  { %976 = shalt.err (!%p973_p4)
}
  0x2b   :  { %s977_s6 = scalar_lea.vmem %s45_s21, 1024  ;;  %p982_p6 = scmp.lt.s32.totalorder %s45_s21, %s45_s21 }
  0x2c   :  { %p978_p5 = scmp.ne.s32.totalorder %s45_s21, %s977_s6  ;;  %p983_p7 = scmp.lt.s32.totalorder %s977_s6, %s977_s6 }
  0x2e   :  { %p984_p8 = por %p983_p7, %p982_p6 }
  0x30   :  { %p985_p9 = pnand %p984_p8, %p978_p5 }
  0x32   :  { %988 = shalt.err (!%p985_p9)
}
  0x33   :  { %50 = dma.hbm_to_vmem [thread:$0]  %s1320_s3, 1024, %s45_s21, [#allocation6], %s1018_s28, %s1018_s28, %s1019_s29  }
  0x34   :  { %1011 = dma.done.wait [#allocation3], 4096  }
  0x35   :  { %1012 = vsyncadd [#allocation3], 4294963200 }
  0x36   :  { %1013 = dma.done.wait [#allocation6], 2048  }
  0x37   :  { %1014 = vsyncadd [#allocation6], 4294965248  ;;  %v907_v0 = vld [vmem:[#allocation5] sm:$0xff]   ;;  %v908_v1 = vld [vmem:[#allocation5 + $0x8] sm:$0xff]  }
  0x38   :  { %803 = vmatprep.subr.bf16.mxu0 %v907_v0  ;;  %v909_v2 = vld [vmem:[#allocation5 + $0x10] sm:$0xff]   ;;  %v910_v3 = vld [vmem:[#allocation5 + $0x18] sm:$0xff]   ;;  %v1100_v4 = vld [vmem:[#allocation2] sm:$0xff] }
  0x39   :  { %804 = vmatpush3.bf16.msra.mxu0 %v907_v0  ;;  %v1102_v5 = vld [vmem:[#allocation2 + $0x8] sm:$0xff]  ;;  %v911_v7 = vld [vmem:[#allocation5 + $0x20] sm:$0xff]   ;;  %v913_v9 = vld [vmem:[#allocation5 + $0x30] sm:$0xff]  }
  0x3a   :  { %805 = vmatprep.subr.bf16.mxu0 %v908_v1  ;;  %v95_v6 = vpack.c.bf16 %v1102_v5, %v1100_v4  ;;  %v912_v8 = vld [vmem:[#allocation5 + $0x28] sm:$0xff]   ;;  %v915_v10 = vld [vmem:[#allocation7] sm:$0xff]   ;;  %v917_v12 = vld [vmem:[#allocation7 + $0x10] sm:$0xff]  }
  0x3b   :  { %v916_v11 = vld [vmem:[#allocation7 + $0x8] sm:$0xff]   ;;  %851 = vmatprep.subr.bf16.mxu1 %v915_v10  ;;  %v914_v13 = vld [vmem:[#allocation5 + $0x38] sm:$0xff]   ;;  %v1106_v14 = vld [vmem:[#allocation2 + $0x10] sm:$0xff] }
  0x3c   :  { %819 = vmatprep.mubr.bf16.mxu0 %v95_v6  ;;  %852 = vmatpush3.bf16.msra.mxu1 %v915_v10  ;;  %v1108_v15 = vld [vmem:[#allocation2 + $0x18] sm:$0xff]  ;;  %v1110_v17 = vld [vmem:[#allocation2 + $0x20] sm:$0xff]  ;;  %v1112_v18 = vld [vmem:[#allocation2 + $0x28] sm:$0xff] }
  0x3d   :  { %806 = vmatpush3.bf16.msra.mxu0 %v908_v1  ;;  %853 = vmatprep.subr.bf16.mxu1 %v916_v11  ;;  %v918_v16 = vld [vmem:[#allocation7 + $0x18] sm:$0xff]   ;;  %v96_v19 = vpack.c.bf16 %v1108_v15, %v1106_v14  ;;  %v97_v20 = vpack.c.bf16 %v1112_v18, %v1110_v17  ;;  %v919_v21 = vld [vmem:[#allocation7 + $0x20] sm:$0xff]   ;;  %v1118_v22 = vld [vmem:[#allocation2 + $0x30] sm:$0xff] }
  0x3e   :  { %807 = vmatprep.subr.bf16.mxu0 %v909_v2  ;;  %v1120_v23 = vld [vmem:[#allocation2 + $0x38] sm:$0xff]  ;;  %v920_v24 = vld [vmem:[#allocation7 + $0x28] sm:$0xff]   ;;  %v1122_v25 = vld [vmem:[#allocation2 + $0x40] sm:$0xff] }
  0x3f   :  { %v1124_v26 = vld [vmem:[#allocation2 + $0x48] sm:$0xff]  ;;  %v98_v27 = vpack.c.bf16 %v1120_v23, %v1118_v22  ;;  %v1130_v29 = vld [vmem:[#allocation2 + $0x50] sm:$0xff]  ;;  %v1132_v30 = vld [vmem:[#allocation2 + $0x58] sm:$0xff] }
  0x40   :  { %854 = vmatpush3.bf16.msra.mxu1 %v916_v11  ;;  %v99_v28 = vpack.c.bf16 %v1124_v26, %v1122_v25  ;;  %v1134_v31 = vld [vmem:[#allocation2 + $0x60] sm:$0xff]  ;;  %v1136_v32 = vld [vmem:[#allocation2 + $0x68] sm:$0xff]  ;;  %v100_v33 = vpack.c.bf16 %v1132_v30, %v1130_v29  ;;  %v1142_v35 = vld [vmem:[#allocation2 + $0x70] sm:$0xff] }
  0x41   :  { %808 = vmatpush3.bf16.msra.mxu0 %v909_v2  ;;  %855 = vmatprep.subr.bf16.mxu1 %v917_v12  ;;  %v101_v34 = vpack.c.bf16 %v1136_v32, %v1134_v31  ;;  %v1144_v36 = vld [vmem:[#allocation2 + $0x78] sm:$0xff]  ;;  %v1146_v37 = vld [vmem:[#allocation2 + $0x80] sm:$0xff]  ;;  %v1148_v38 = vld [vmem:[#allocation2 + $0x88] sm:$0xff] }
  0x42   :  { %809 = vmatprep.subr.bf16.mxu0 %v910_v3  ;;  %v102_v39 = vpack.c.bf16 %v1144_v36, %v1142_v35  ;;  %v103_v40 = vpack.c.bf16 %v1148_v38, %v1146_v37  ;;  %v1154_v41 = vld [vmem:[#allocation2 + $0x90] sm:$0xff]  ;;  %v1156_v42 = vld [vmem:[#allocation2 + $0x98] sm:$0xff]  ;;  %v1158_v43 = vld [vmem:[#allocation2 + $0xa0] sm:$0xff] }
  0x43   :  { %v1160_v44 = vld [vmem:[#allocation2 + $0xa8] sm:$0xff]  ;;  %v104_v45 = vpack.c.bf16 %v1156_v42, %v1154_v41  ;;  %v1166_v47 = vld [vmem:[#allocation2 + $0xb0] sm:$0xff]  ;;  %v1168_v48 = vld [vmem:[#allocation2 + $0xb8] sm:$0xff] }
  0x44   :  { %856 = vmatpush3.bf16.msra.mxu1 %v917_v12  ;;  %v105_v46 = vpack.c.bf16 %v1160_v44, %v1158_v43  ;;  %v1170_v49 = vld [vmem:[#allocation2 + $0xc0] sm:$0xff]  ;;  %v1172_v50 = vld [vmem:[#allocation2 + $0xc8] sm:$0xff]  ;;  %v106_v51 = vpack.c.bf16 %v1168_v48, %v1166_v47  ;;  %v1178_v53 = vld [vmem:[#allocation2 + $0xd0] sm:$0xff] }
  0x45   :  { %810 = vmatpush3.bf16.msra.mxu0 %v910_v3  ;;  %857 = vmatprep.subr.bf16.mxu1 %v918_v16  ;;  %v107_v52 = vpack.c.bf16 %v1172_v50, %v1170_v49  ;;  %v1180_v54 = vld [vmem:[#allocation2 + $0xd8] sm:$0xff]  ;;  %v1182_v55 = vld [vmem:[#allocation2 + $0xe0] sm:$0xff]  ;;  %v1184_v56 = vld [vmem:[#allocation2 + $0xe8] sm:$0xff] }
  0x46   :  { %811 = vmatprep.subr.bf16.mxu0 %v911_v7  ;;  %v108_v57 = vpack.c.bf16 %v1180_v54, %v1178_v53  ;;  %v109_v58 = vpack.c.bf16 %v1184_v56, %v1182_v55  ;;  %v1190_v59 = vld [vmem:[#allocation2 + $0xf0] sm:$0xff]  ;;  %v1192_v60 = vld [vmem:[#allocation2 + $0xf8] sm:$0xff]  ;;  %v1199_v0 = vld [vmem:[%s1319_s2] ss:$0 sm:$0xff] }
  0x47   :  { %v110_v61 = vpack.c.bf16 %v1192_v60, %v1190_v59  ;;  %v921_v62 = vld [vmem:[#allocation7 + $0x30] sm:$0xff]   ;;  %v922_v63 = vld [vmem:[#allocation7 + $0x38] sm:$0xff]  }
  0x48   :  { %858 = vmatpush3.bf16.msra.mxu1 %v918_v16 }
  0x49   :  { %812 = vmatpush3.bf16.msra.mxu0 %v911_v7  ;;  %859 = vmatprep.subr.bf16.mxu1 %v919_v21 }
  0x4a   :  { %813 = vmatprep.subr.bf16.mxu0 %v912_v8 }
  0x4c   :  { %860 = vmatpush3.bf16.msra.mxu1 %v919_v21 }
  0x4d   :  { %814 = vmatpush3.bf16.msra.mxu0 %v912_v8  ;;  %861 = vmatprep.subr.bf16.mxu1 %v920_v24 }
  0x4e   :  { %815 = vmatprep.subr.bf16.mxu0 %v913_v9 }
  0x50   :  { %862 = vmatpush3.bf16.msra.mxu1 %v920_v24 }
  0x51   :  { %816 = vmatpush3.bf16.msra.mxu0 %v913_v9  ;;  %863 = vmatprep.subr.bf16.mxu1 %v921_v62 }
  0x52   :  { %817 = vmatprep.subr.bf16.mxu0 %v914_v13 }
  0x54   :  { %864 = vmatpush3.bf16.msra.mxu1 %v921_v62 }
  0x55   :  { %818 = vmatpush3.bf16.msra.mxu0 %v914_v13  ;;  %865 = vmatprep.subr.bf16.mxu1 %v922_v63 }
  0x58   :  { %820 = vmatmul.mubr.bf16.vlgmr.msra.gmra.mrb[0].mxu0 %v96_v19  ;;  %866 = vmatpush3.bf16.msra.mxu1 %v922_v63 }
  0x59   :  { %823 = vmatprep.mubr.bf16.mxu0 %v97_v20 }
  0x60   :  { %824 = vmatmul.mubr.bf16.gmra.mrb[4].mxu0 %v98_v27 }
  0x61   :  { %827 = vmatprep.mubr.bf16.mxu0 %v99_v28 }
  0x68   :  { %828 = vmatmul.mubr.bf16.gmra.mrb[8].mxu0 %v100_v33 }
  0x69   :  { %831 = vmatprep.mubr.bf16.mxu0 %v101_v34 }
  0x70   :  { %832 = vmatmul.mubr.bf16.gmra.mrb[12].mxu0 %v102_v39 }
  0x71   :  { %835 = vmatprep.mubr.bf16.mxu0 %v103_v40 }
  0x78   :  { %836 = vmatmul.mubr.bf16.gmra.mrb[16].mxu0 %v104_v45 }
  0x79   :  { %839 = vmatprep.mubr.bf16.mxu0 %v105_v46 }
  0x80   :  { %840 = vmatmul.mubr.bf16.gmra.mrb[20].mxu0 %v106_v51 }
  0x81   :  { %843 = vmatprep.mubr.bf16.mxu0 %v107_v52 }
  0x88   :  { %844 = vmatmul.mubr.bf16.gmra.mrb[24].mxu0 %v108_v57 }
  0x89   :  { %847 = vmatprep.mubr.bf16.mxu0 %v109_v58 }
  0x90   :  { %848 = vmatmul.mubr.bf16.gmra.mrb[28].mxu0 %v110_v61 }
 0x12b   :  { %v821_v1 = vpop.f32.mrb[0].mxu0 }
 0x12c   :  { %v225_v2 = vadd.f32 %v821_v1, %v1199_v0  ;;  %v216_v3 = vpop.f32.mrb[1].mxu0 }
 0x12d   :  { %v217_v6 = vadd.f32 %v1199_v0, %v216_v3  ;;  %v822_v7 = vpop.f32.mrb[2].mxu0 }
 0x12e   :  { %v228_v8 = vadd.f32 %v822_v7, %v1199_v0  ;;  %v219_v9 = vpop.f32.mrb[3].mxu0  ;;  %v345_v11 = vmax.f32 %v225_v2, 0.0 }
 0x12f   :  { %v220_v10 = vadd.f32 %v1199_v0, %v219_v9  ;;  %v343_v13 = vmax.f32 %v217_v6, 0.0 }
 0x130   :  { %v346_v12 = vmax.f32 %v228_v8, 0.0 }
 0x131   :  { %v344_v16 = vmax.f32 %v220_v10, 0.0 }
 0x132   :  { %v376_v19 = vpack.c.bf16 %v346_v12, %v345_v11 }
 0x133   :  { %v825_v20 = vpop.f32.mrb[4].mxu0  ;;  %v375_v21 = vpack.c.bf16 %v344_v16, %v343_v13 }
 0x134   :  { %v241_v24 = vadd.f32 %v825_v20, %v1199_v0  ;;  %v232_v27 = vpop.f32.mrb[5].mxu0 }
 0x135   :  { %v233_v28 = vadd.f32 %v1199_v0, %v232_v27  ;;  %v826_v33 = vpop.f32.mrb[6].mxu0  ;;  %867 = vmatprep.mubr.bf16.mxu1 %v375_v21 }
 0x136   :  { %v244_v34 = vadd.f32 %v826_v33, %v1199_v0  ;;  %v235_v39 = vpop.f32.mrb[7].mxu0  ;;  %868 = vmatmul.mubr.bf16.vlgmr.msra.gmra.mrb[0].mxu1 %v376_v19  ;;  %v349_v45 = vmax.f32 %v241_v24, 0.0 }
 0x137   :  { %v236_v40 = vadd.f32 %v1199_v0, %v235_v39  ;;  %v347_v51 = vmax.f32 %v233_v28, 0.0 }
 0x138   :  { %v350_v46 = vmax.f32 %v244_v34, 0.0 }
 0x139   :  { %v348_v52 = vmax.f32 %v236_v40, 0.0 }
 0x13a   :  { %v378_v57 = vpack.c.bf16 %v350_v46, %v349_v45 }
 0x13b   :  { %v377_v58 = vpack.c.bf16 %v348_v52, %v347_v51  ;;  %v829_v61 = vpop.f32.mrb[8].mxu0 }
 0x13c   :  { %v257_v62 = vadd.f32 %v829_v61, %v1199_v0  ;;  %v248_v63 = vpop.f32.mrb[9].mxu0 }
 0x13d   :  { %v249_v1 = vadd.f32 %v1199_v0, %v248_v63  ;;  %v830_v2 = vpop.f32.mrb[10].mxu0  ;;  %871 = vmatprep.mubr.bf16.mxu1 %v377_v58 }
 0x13e   :  { %v260_v3 = vadd.f32 %v830_v2, %v1199_v0  ;;  %v251_v6 = vpop.f32.mrb[11].mxu0  ;;  %872 = vmatmul.mubr.bf16.gmra.mrb[4].mxu1 %v378_v57  ;;  %v353_v8 = vmax.f32 %v257_v62, 0.0 }
 0x13f   :  { %v252_v7 = vadd.f32 %v1199_v0, %v251_v6  ;;  %v351_v10 = vmax.f32 %v249_v1, 0.0 }
 0x140   :  { %v354_v9 = vmax.f32 %v260_v3, 0.0 }
 0x141   :  { %v352_v11 = vmax.f32 %v252_v7, 0.0 }
 0x142   :  { %v380_v12 = vpack.c.bf16 %v354_v9, %v353_v8 }
 0x143   :  { %v379_v13 = vpack.c.bf16 %v352_v11, %v351_v10  ;;  %v833_v16 = vpop.f32.mrb[12].mxu0 }
 0x144   :  { %v273_v19 = vadd.f32 %v833_v16, %v1199_v0  ;;  %v264_v20 = vpop.f32.mrb[13].mxu0 }
 0x145   :  { %v265_v21 = vadd.f32 %v1199_v0, %v264_v20  ;;  %v834_v24 = vpop.f32.mrb[14].mxu0  ;;  %875 = vmatprep.mubr.bf16.mxu1 %v379_v13 }
 0x146   :  { %v276_v27 = vadd.f32 %v834_v24, %v1199_v0  ;;  %v267_v28 = vpop.f32.mrb[15].mxu0  ;;  %876 = vmatmul.mubr.bf16.gmra.mrb[8].mxu1 %v380_v12  ;;  %v357_v34 = vmax.f32 %v273_v19, 0.0 }
 0x147   :  { %v268_v33 = vadd.f32 %v1199_v0, %v267_v28  ;;  %v355_v40 = vmax.f32 %v265_v21, 0.0 }
 0x148   :  { %v358_v39 = vmax.f32 %v276_v27, 0.0 }
 0x149   :  { %v356_v45 = vmax.f32 %v268_v33, 0.0 }
 0x14a   :  { %v382_v46 = vpack.c.bf16 %v358_v39, %v357_v34 }
 0x14b   :  { %v381_v51 = vpack.c.bf16 %v356_v45, %v355_v40  ;;  %v837_v52 = vpop.f32.mrb[16].mxu0 }
 0x14c   :  { %v289_v57 = vadd.f32 %v837_v52, %v1199_v0  ;;  %v280_v58 = vpop.f32.mrb[17].mxu0 }
 0x14d   :  { %v281_v61 = vadd.f32 %v1199_v0, %v280_v58  ;;  %v838_v62 = vpop.f32.mrb[18].mxu0  ;;  %879 = vmatprep.mubr.bf16.mxu1 %v381_v51 }
 0x14e   :  { %v292_v63 = vadd.f32 %v838_v62, %v1199_v0  ;;  %v283_v1 = vpop.f32.mrb[19].mxu0  ;;  %880 = vmatmul.mubr.bf16.gmra.mrb[12].mxu1 %v382_v46  ;;  %v361_v3 = vmax.f32 %v289_v57, 0.0 }
 0x14f   :  { %v284_v2 = vadd.f32 %v1199_v0, %v283_v1  ;;  %v359_v7 = vmax.f32 %v281_v61, 0.0 }
 0x150   :  { %v362_v6 = vmax.f32 %v292_v63, 0.0 }
 0x151   :  { %v360_v8 = vmax.f32 %v284_v2, 0.0 }
 0x152   :  { %v384_v9 = vpack.c.bf16 %v362_v6, %v361_v3 }
 0x153   :  { %v383_v10 = vpack.c.bf16 %v360_v8, %v359_v7  ;;  %v841_v11 = vpop.f32.mrb[20].mxu0 }
 0x154   :  { %v305_v12 = vadd.f32 %v841_v11, %v1199_v0  ;;  %v296_v13 = vpop.f32.mrb[21].mxu0 }
 0x155   :  { %v297_v16 = vadd.f32 %v1199_v0, %v296_v13  ;;  %v842_v19 = vpop.f32.mrb[22].mxu0  ;;  %883 = vmatprep.mubr.bf16.mxu1 %v383_v10 }
 0x156   :  { %v308_v20 = vadd.f32 %v842_v19, %v1199_v0  ;;  %v299_v21 = vpop.f32.mrb[23].mxu0  ;;  %884 = vmatmul.mubr.bf16.gmra.mrb[16].mxu1 %v384_v9  ;;  %v365_v27 = vmax.f32 %v305_v12, 0.0 }
 0x157   :  { %v300_v24 = vadd.f32 %v1199_v0, %v299_v21  ;;  %v363_v33 = vmax.f32 %v297_v16, 0.0 }
 0x158   :  { %v366_v28 = vmax.f32 %v308_v20, 0.0 }
 0x159   :  { %v364_v34 = vmax.f32 %v300_v24, 0.0 }
 0x15a   :  { %v386_v39 = vpack.c.bf16 %v366_v28, %v365_v27 }
 0x15b   :  { %v385_v40 = vpack.c.bf16 %v364_v34, %v363_v33  ;;  %v845_v45 = vpop.f32.mrb[24].mxu0  ;;  %v1236_v34 = vld [vmem:[%s1321_s4] ss:$0 sm:$0xff]  ;;  %s1024_s4 = smov [#allocation8]  }
 0x15c   :  { %v321_v46 = vadd.f32 %v845_v45, %v1199_v0  ;;  %v312_v51 = vpop.f32.mrb[25].mxu0  ;;  %s724_s8 = sshll.u32 %s1024_s4, 4  ;;  %s725_s8 = int_to_ptr.vmem [resolvable:$true] %s724_s8 }
 0x15d   :  { %v313_v52 = vadd.f32 %v1199_v0, %v312_v51  ;;  %v846_v57 = vpop.f32.mrb[26].mxu0  ;;  %887 = vmatprep.mubr.bf16.mxu1 %v385_v40  ;;  %s989_s9 = scalar_lea.vmem %s725_s8, 4096  ;;  %p994_p11 = scmp.lt.s32.totalorder %s725_s8, %s725_s8 }
 0x15e   :  { %v324_v58 = vadd.f32 %v846_v57, %v1199_v0  ;;  %v315_v61 = vpop.f32.mrb[27].mxu0  ;;  %888 = vmatmul.mubr.bf16.gmra.mrb[20].mxu1 %v386_v39  ;;  %v369_v63 = vmax.f32 %v321_v46, 0.0  ;;  %p990_p10 = scmp.ne.s32.totalorder %s725_s8, %s989_s9  ;;  %p995_p12 = scmp.lt.s32.totalorder %s989_s9, %s989_s9 }
 0x15f   :  { %v316_v62 = vadd.f32 %v1199_v0, %v315_v61  ;;  %v367_v2 = vmax.f32 %v313_v52, 0.0 }
 0x160   :  { %v370_v1 = vmax.f32 %v324_v58, 0.0  ;;  %p996_p13 = por %p995_p12, %p994_p11 }
 0x161   :  { %v368_v3 = vmax.f32 %v316_v62, 0.0 }
 0x162   :  { %v388_v6 = vpack.c.bf16 %v370_v1, %v369_v63  ;;  %p997_p0 = pnand %p996_p13, %p990_p10 }
 0x163   :  { %v387_v7 = vpack.c.bf16 %v368_v3, %v367_v2  ;;  %v849_v8 = vpop.f32.mrb[28].mxu0 }
 0x164   :  { %v337_v9 = vadd.f32 %v849_v8, %v1199_v0  ;;  %v328_v10 = vpop.f32.mrb[29].mxu0 }
 0x165   :  { %v329_v11 = vadd.f32 %v1199_v0, %v328_v10  ;;  %v850_v12 = vpop.f32.mrb[30].mxu0  ;;  %891 = vmatprep.mubr.bf16.mxu1 %v387_v7 }
 0x166   :  { %v340_v13 = vadd.f32 %v850_v12, %v1199_v0  ;;  %v331_v16 = vpop.f32.mrb[31].mxu0  ;;  %892 = vmatmul.mubr.bf16.gmra.mrb[24].mxu1 %v388_v6  ;;  %v373_v20 = vmax.f32 %v337_v9, 0.0 }
 0x167   :  { %v332_v19 = vadd.f32 %v1199_v0, %v331_v16  ;;  %v371_v24 = vmax.f32 %v329_v11, 0.0 }
 0x168   :  { %v374_v21 = vmax.f32 %v340_v13, 0.0 }
 0x169   :  { %v372_v27 = vmax.f32 %v332_v19, 0.0 }
 0x16a   :  { %v390_v28 = vpack.c.bf16 %v374_v21, %v373_v20 }
 0x16b   :  { %v389_v33 = vpack.c.bf16 %v372_v27, %v371_v24 }
 0x16d   :  { %895 = vmatprep.mubr.bf16.mxu1 %v389_v33 }
 0x16e   :  { %896 = vmatmul.mubr.bf16.gmra.mrb[28].mxu1 %v390_v28 }
 0x209   :  { %v869_v39 = vpop.f32.mrb[0].mxu1 }
 0x20a   :  { %v505_v40 = vadd.f32 %v869_v39, %v1236_v34  ;;  %v496_v45 = vpop.f32.mrb[1].mxu1 }
 0x20b   :  { %v497_v46 = vadd.f32 %v1236_v34, %v496_v45  ;;  %v870_v0 = vpop.f32.mrb[2].mxu1 }
 0x20c   :  { %v625_v51 = vmax.f32 %v505_v40, 0.0  ;;  %v508_v52 = vadd.f32 %v870_v0, %v1236_v34  ;;  %v499_v57 = vpop.f32.mrb[3].mxu1 }
 0x20d   :  { %v623_v58 = vmax.f32 %v497_v46, 0.0  ;;  %v500_v61 = vadd.f32 %v1236_v34, %v499_v57 }
 0x20e   :  { %v657_v62 = vadd.f32 %v625_v51, %v1106_v14  ;;  %v626_v63 = vmax.f32 %v508_v52, 0.0 }
 0x20f   :  { %v655_v1 = vadd.f32 %v623_v58, %v1100_v4  ;;  %v624_v2 = vmax.f32 %v500_v61, 0.0 }
 0x210   :  { %689 = vst [vmem:[#allocation8 + $0x10] sm:$0xff] %v657_v62  ;;  %v658_v3 = vadd.f32 %v626_v63, %v1108_v15 }
 0x211   :  { %687 = vst [vmem:[#allocation8] sm:$0xff] %v655_v1  ;;  %v656_v6 = vadd.f32 %v624_v2, %v1102_v5  ;;  %v873_v7 = vpop.f32.mrb[4].mxu1 }
 0x212   :  { %690 = vst [vmem:[#allocation8 + $0x18] sm:$0xff] %v658_v3  ;;  %v521_v8 = vadd.f32 %v873_v7, %v1236_v34  ;;  %v512_v9 = vpop.f32.mrb[5].mxu1 }
 0x213   :  { %688 = vst [vmem:[#allocation8 + $0x8] sm:$0xff] %v656_v6  ;;  %v513_v10 = vadd.f32 %v1236_v34, %v512_v9  ;;  %v874_v11 = vpop.f32.mrb[6].mxu1 }
 0x214   :  { %v629_v14 = vmax.f32 %v521_v8, 0.0  ;;  %v524_v12 = vadd.f32 %v874_v11, %v1236_v34  ;;  %v515_v4 = vpop.f32.mrb[7].mxu1 }
 0x215   :  { %v627_v13 = vmax.f32 %v513_v10, 0.0  ;;  %v516_v16 = vadd.f32 %v1236_v34, %v515_v4 }
 0x216   :  { %v661_v15 = vadd.f32 %v629_v14, %v1118_v22  ;;  %v630_v19 = vmax.f32 %v524_v12, 0.0 }
 0x217   :  { %v659_v5 = vadd.f32 %v627_v13, %v1110_v17  ;;  %v628_v20 = vmax.f32 %v516_v16, 0.0 }
 0x218   :  { %693 = vst [vmem:[#allocation8 + $0x30] sm:$0xff] %v661_v15  ;;  %v662_v21 = vadd.f32 %v630_v19, %v1120_v23 }
 0x219   :  { %691 = vst [vmem:[#allocation8 + $0x20] sm:$0xff] %v659_v5  ;;  %v660_v24 = vadd.f32 %v628_v20, %v1112_v18  ;;  %v877_v27 = vpop.f32.mrb[8].mxu1 }
 0x21a   :  { %694 = vst [vmem:[#allocation8 + $0x38] sm:$0xff] %v662_v21  ;;  %v537_v28 = vadd.f32 %v877_v27, %v1236_v34  ;;  %v528_v33 = vpop.f32.mrb[9].mxu1 }
 0x21b   :  { %692 = vst [vmem:[#allocation8 + $0x28] sm:$0xff] %v660_v24  ;;  %v529_v39 = vadd.f32 %v1236_v34, %v528_v33  ;;  %v878_v40 = vpop.f32.mrb[10].mxu1 }
 0x21c   :  { %v633_v22 = vmax.f32 %v537_v28, 0.0  ;;  %v540_v45 = vadd.f32 %v878_v40, %v1236_v34  ;;  %v531_v17 = vpop.f32.mrb[11].mxu1 }
 0x21d   :  { %v631_v46 = vmax.f32 %v529_v39, 0.0  ;;  %v532_v0 = vadd.f32 %v1236_v34, %v531_v17 }
 0x21e   :  { %v665_v23 = vadd.f32 %v633_v22, %v1130_v29  ;;  %v634_v51 = vmax.f32 %v540_v45, 0.0 }
 0x21f   :  { %v663_v18 = vadd.f32 %v631_v46, %v1122_v25  ;;  %v632_v52 = vmax.f32 %v532_v0, 0.0 }
 0x220   :  { %697 = vst [vmem:[#allocation8 + $0x50] sm:$0xff] %v665_v23  ;;  %v666_v57 = vadd.f32 %v634_v51, %v1132_v30 }
 0x221   :  { %695 = vst [vmem:[#allocation8 + $0x40] sm:$0xff] %v663_v18  ;;  %v664_v58 = vadd.f32 %v632_v52, %v1124_v26  ;;  %v881_v61 = vpop.f32.mrb[12].mxu1 }
 0x222   :  { %698 = vst [vmem:[#allocation8 + $0x58] sm:$0xff] %v666_v57  ;;  %v553_v62 = vadd.f32 %v881_v61, %v1236_v34  ;;  %v544_v63 = vpop.f32.mrb[13].mxu1 }
 0x223   :  { %696 = vst [vmem:[#allocation8 + $0x48] sm:$0xff] %v664_v58  ;;  %v545_v1 = vadd.f32 %v1236_v34, %v544_v63  ;;  %v882_v2 = vpop.f32.mrb[14].mxu1 }
 0x224   :  { %v637_v29 = vmax.f32 %v553_v62, 0.0  ;;  %v556_v3 = vadd.f32 %v882_v2, %v1236_v34  ;;  %v547_v25 = vpop.f32.mrb[15].mxu1 }
 0x225   :  { %v635_v6 = vmax.f32 %v545_v1, 0.0  ;;  %v548_v7 = vadd.f32 %v1236_v34, %v547_v25 }
 0x226   :  { %v669_v30 = vadd.f32 %v637_v29, %v1142_v35  ;;  %v638_v8 = vmax.f32 %v556_v3, 0.0 }
 0x227   :  { %v667_v26 = vadd.f32 %v635_v6, %v1134_v31  ;;  %v636_v9 = vmax.f32 %v548_v7, 0.0 }
 0x228   :  { %701 = vst [vmem:[#allocation8 + $0x70] sm:$0xff] %v669_v30  ;;  %v670_v10 = vadd.f32 %v638_v8, %v1144_v36 }
 0x229   :  { %699 = vst [vmem:[#allocation8 + $0x60] sm:$0xff] %v667_v26  ;;  %v668_v11 = vadd.f32 %v636_v9, %v1136_v32  ;;  %v885_v14 = vpop.f32.mrb[16].mxu1 }
 0x22a   :  { %702 = vst [vmem:[#allocation8 + $0x78] sm:$0xff] %v670_v10  ;;  %v569_v12 = vadd.f32 %v885_v14, %v1236_v34  ;;  %v560_v4 = vpop.f32.mrb[17].mxu1 }
 0x22b   :  { %700 = vst [vmem:[#allocation8 + $0x68] sm:$0xff] %v668_v11  ;;  %v561_v13 = vadd.f32 %v1236_v34, %v560_v4  ;;  %v886_v16 = vpop.f32.mrb[18].mxu1 }
 0x22c   :  { %v641_v35 = vmax.f32 %v569_v12, 0.0  ;;  %v572_v15 = vadd.f32 %v886_v16, %v1236_v34  ;;  %v563_v31 = vpop.f32.mrb[19].mxu1 }
 0x22d   :  { %v639_v19 = vmax.f32 %v561_v13, 0.0  ;;  %v564_v5 = vadd.f32 %v1236_v34, %v563_v31 }
 0x22e   :  { %v673_v36 = vadd.f32 %v641_v35, %v1154_v41  ;;  %v642_v20 = vmax.f32 %v572_v15, 0.0 }
 0x22f   :  { %v671_v32 = vadd.f32 %v639_v19, %v1146_v37  ;;  %v640_v21 = vmax.f32 %v564_v5, 0.0 }
 0x230   :  { %705 = vst [vmem:[#allocation8 + $0x90] sm:$0xff] %v673_v36  ;;  %v674_v24 = vadd.f32 %v642_v20, %v1156_v42 }
 0x231   :  { %703 = vst [vmem:[#allocation8 + $0x80] sm:$0xff] %v671_v32  ;;  %v672_v27 = vadd.f32 %v640_v21, %v1148_v38  ;;  %v889_v28 = vpop.f32.mrb[20].mxu1 }
 0x232   :  { %706 = vst [vmem:[#allocation8 + $0x98] sm:$0xff] %v674_v24  ;;  %v585_v33 = vadd.f32 %v889_v28, %v1236_v34  ;;  %v576_v39 = vpop.f32.mrb[21].mxu1 }
 0x233   :  { %704 = vst [vmem:[#allocation8 + $0x88] sm:$0xff] %v672_v27  ;;  %v577_v40 = vadd.f32 %v1236_v34, %v576_v39  ;;  %v890_v22 = vpop.f32.mrb[22].mxu1 }
 0x234   :  { %v645_v41 = vmax.f32 %v585_v33, 0.0  ;;  %v588_v45 = vadd.f32 %v890_v22, %v1236_v34  ;;  %v579_v37 = vpop.f32.mrb[23].mxu1 }
 0x235   :  { %v643_v17 = vmax.f32 %v577_v40, 0.0  ;;  %v580_v46 = vadd.f32 %v1236_v34, %v579_v37 }
 0x236   :  { %v677_v42 = vadd.f32 %v645_v41, %v1166_v47  ;;  %v646_v0 = vmax.f32 %v588_v45, 0.0 }
 0x237   :  { %v675_v38 = vadd.f32 %v643_v17, %v1158_v43  ;;  %v644_v23 = vmax.f32 %v580_v46, 0.0 }
 0x238   :  { %709 = vst [vmem:[#allocation8 + $0xb0] sm:$0xff] %v677_v42  ;;  %v678_v51 = vadd.f32 %v646_v0, %v1168_v48 }
 0x239   :  { %707 = vst [vmem:[#allocation8 + $0xa0] sm:$0xff] %v675_v38  ;;  %v676_v18 = vadd.f32 %v644_v23, %v1160_v44  ;;  %v893_v52 = vpop.f32.mrb[24].mxu1 }
 0x23a   :  { %710 = vst [vmem:[#allocation8 + $0xb8] sm:$0xff] %v678_v51  ;;  %v601_v57 = vadd.f32 %v893_v52, %v1236_v34  ;;  %v592_v58 = vpop.f32.mrb[25].mxu1 }
 0x23b   :  { %708 = vst [vmem:[#allocation8 + $0xa8] sm:$0xff] %v676_v18  ;;  %v593_v61 = vadd.f32 %v1236_v34, %v592_v58  ;;  %v894_v62 = vpop.f32.mrb[26].mxu1 }
 0x23c   :  { %v649_v47 = vmax.f32 %v601_v57, 0.0  ;;  %v604_v63 = vadd.f32 %v894_v62, %v1236_v34  ;;  %v595_v43 = vpop.f32.mrb[27].mxu1 }
 0x23d   :  { %v647_v1 = vmax.f32 %v593_v61, 0.0  ;;  %v596_v2 = vadd.f32 %v1236_v34, %v595_v43 }
 0x23e   :  { %v681_v48 = vadd.f32 %v649_v47, %v1178_v53  ;;  %v650_v29 = vmax.f32 %v604_v63, 0.0 }
 0x23f   :  { %v679_v44 = vadd.f32 %v647_v1, %v1170_v49  ;;  %v648_v3 = vmax.f32 %v596_v2, 0.0 }
 0x240   :  { %713 = vst [vmem:[#allocation8 + $0xd0] sm:$0xff] %v681_v48  ;;  %v682_v25 = vadd.f32 %v650_v29, %v1180_v54 }
 0x241   :  { %711 = vst [vmem:[#allocation8 + $0xc0] sm:$0xff] %v679_v44  ;;  %v680_v6 = vadd.f32 %v648_v3, %v1172_v50  ;;  %v897_v7 = vpop.f32.mrb[28].mxu1 }
 0x242   :  { %714 = vst [vmem:[#allocation8 + $0xd8] sm:$0xff] %v682_v25  ;;  %v617_v30 = vadd.f32 %v897_v7, %v1236_v34  ;;  %v608_v8 = vpop.f32.mrb[29].mxu1 }
 0x243   :  { %712 = vst [vmem:[#allocation8 + $0xc8] sm:$0xff] %v680_v6  ;;  %v609_v26 = vadd.f32 %v1236_v34, %v608_v8  ;;  %v898_v9 = vpop.f32.mrb[30].mxu1 }
 0x244   :  { %v653_v53 = vmax.f32 %v617_v30, 0.0  ;;  %v620_v10 = vadd.f32 %v898_v9, %v1236_v34  ;;  %v611_v49 = vpop.f32.mrb[31].mxu1 }
 0x245   :  { %v651_v11 = vmax.f32 %v609_v26, 0.0  ;;  %v612_v14 = vadd.f32 %v1236_v34, %v611_v49 }
 0x246   :  { %v685_v54 = vadd.f32 %v653_v53, %v1190_v59  ;;  %v654_v12 = vmax.f32 %v620_v10, 0.0 }
 0x247   :  { %v683_v50 = vadd.f32 %v651_v11, %v1182_v55  ;;  %v652_v4 = vmax.f32 %v612_v14, 0.0 }
 0x248   :  { %717 = vst [vmem:[#allocation8 + $0xf0] sm:$0xff] %v685_v54  ;;  %v686_v13 = vadd.f32 %v654_v12, %v1192_v60 }
 0x249   :  { %715 = vst [vmem:[#allocation8 + $0xe0] sm:$0xff] %v683_v50  ;;  %v684_v16 = vadd.f32 %v652_v4, %v1184_v56 }
 0x24a   :  { %718 = vst [vmem:[#allocation8 + $0xf8] sm:$0xff] %v686_v13 }
 0x24b   :  { %716 = vst [vmem:[#allocation8 + $0xe8] sm:$0xff] %v684_v16 }
 0x24c   :  { %1000 = shalt.err (!%p997_p0)
}
 0x24d   :  { %s1001_s12 = scalar_lea.hbm %s1322_s5, 4096 }
 0x24e   :  { %p1002_p1 = scmp.ne.s32.totalorder %s1322_s5, %s1001_s12  ;;  %p1005_p2 = scmp.lt.u32.totalorder %s1001_s12, %s1322_s5 }
 0x250   :  { %p1007_p3 = pnand %p1005_p2, %p1002_p1 }
 0x252   :  { %1010 = shalt.err (!%p1007_p3)
}
 0x253   :  { %730 = dma.vmem_to_hbm [thread:$0]  %s725_s8, 4096, %s1322_s5, [#allocation4], %s1021_s1, %s1021_s1, %s1022_s17  }
 0x254   :  { %1015 = dma.done.wait [#allocation4], 4096  }
 0x255   :  { %1016 = vsyncadd [#allocation4], 4294963200 }
 0x256   :  { %734 = vsyncpa [#allocation3], 1 }
 0x257   :  { %735 = vsyncpa [#allocation6], 1 }
 0x258   :  { %736 = vsyncpa [#allocation4], 1 }

</bundles_post_ra>
